<compile_context>
chip_gen: v7x
topology: tpu7x:2x2x1
jax: 0.10.0
libtpu: 0.0.40
codegen_flags: <defaults>
</compile_context>

<pallas_src>
import functools
import math

import jax
import jax.numpy as jnp
from jax import lax
from jax.experimental import pallas as pl
from jax.experimental.pallas import tpu as pltpu


# ----------------------------- Pallas kernel ------------------------------ #
def _embeddings_kernel(ids_ref,      # SMEM scalar-prefetch: (B*S,) int32
                       emb_hbm,      # HBM (pl.ANY): (V, H) embedding table
                       pe_ref,       # VMEM: (TR, H) positional-encoding tile
                       gamma_ref,    # VMEM: (1, H) LN scale
                       beta_ref,     # VMEM: (1, H) LN bias
                       out_ref,      # VMEM: (TR, H) output tile
                       gather_buf,   # VMEM scratch: (TR, H), emb dtype
                       copy_sems,    # DMA semaphores: (NSEM,)
                       *, eps: float, rows_per_block: int, num_sems: int):
    base = pl.program_id(0) * rows_per_block

    # Row-gather: one small DMA per token row; all issued before any wait so
    # they overlap. Ids come from SMEM (cheap scalar loads, also used as DMA
    # addresses). Equal-size copies may share a semaphore round-robin.
    copies = []
    for r in range(rows_per_block):
        tok = ids_ref[base + r]
        cp = pltpu.make_async_copy(
            emb_hbm.at[pl.ds(tok, 1), :],
            gather_buf.at[pl.ds(r, 1), :],
            copy_sems.at[r % num_sems])
        cp.start()
        copies.append(cp)
    for cp in copies:
        cp.wait()

    # Token embedding + sinusoidal positional encoding (f32 math).
    x = gather_buf[...].astype(jnp.float32) + pe_ref[...]

    # LayerNorm over hidden dim.
    mean = jnp.mean(x, axis=-1, keepdims=True)
    var = jnp.mean((x - mean) ** 2, axis=-1, keepdims=True)
    y = (x - mean) * lax.rsqrt(var + eps)
    y = y * gamma_ref[...] + beta_ref[...]        # (1, H) broadcasts over rows

    # Dropout: identity in eval mode.
    # TODO(synk): training-mode dropout via pltpu.prng_* if needed.
    out_ref[...] = y.astype(out_ref.dtype)


def _pick_rows_per_block(seq_len: int, max_rows: int = 256) -> int:
    # Largest power-of-two divisor of seq_len capped at max_rows, so every row
    # block lies inside one sequence (contiguous PE slice) and, when possible,
    # is a multiple of 8 sublanes.
    return math.gcd(seq_len, max_rows)


def transformer_embeddings(input_ids, emb_table, pe_table, gamma, beta,
                           *, eps: float = 1e-12, out_dtype=jnp.float32):
    """input_ids: (B, S) int32 -> (B, S, H)."""
    B, S = input_ids.shape
    V, H = emb_table.shape

    tr = _pick_rows_per_block(S)          # rows per grid block (divides S)
    num_rows = B * S
    num_blocks = num_rows // tr
    seq_blocks = S // tr
    num_sems = min(tr, 8)

    ids_flat = input_ids.reshape(num_rows).astype(jnp.int32)
    pe = pe_table[:S, :].astype(jnp.float32)            # (S, H) PE rows
    gamma2 = gamma.reshape(1, H).astype(jnp.float32)
    beta2 = beta.reshape(1, H).astype(jnp.float32)
    # TODO(synk): H should ideally be padded to a multiple of 128 for
    # lane-dense stores; kept as-is to preserve the module's hidden size.

    kernel = functools.partial(_embeddings_kernel, eps=eps,
                               rows_per_block=tr, num_sems=num_sems)

    out_flat = pl.pallas_call(
        kernel,
        out_shape=jax.ShapeDtypeStruct((num_rows, H), out_dtype),
        grid_spec=pltpu.PrefetchScalarGridSpec(
            num_scalar_prefetch=1,                       # ids -> SMEM
            grid=(num_blocks,),
            in_specs=[
                pl.BlockSpec(memory_space=pl.ANY),                      # table stays in HBM
                pl.BlockSpec((tr, H), lambda i, ids: (i % seq_blocks, 0)),  # PE tile
                pl.BlockSpec((1, H), lambda i, ids: (0, 0)),            # LN gamma
                pl.BlockSpec((1, H), lambda i, ids: (0, 0)),            # LN beta
            ],
            out_specs=pl.BlockSpec((tr, H), lambda i, ids: (i, 0)),
            scratch_shapes=[
                pltpu.VMEM((tr, H), emb_table.dtype),    # gather buffer
                pltpu.SemaphoreType.DMA((num_sems,)),
            ],
        ),
        compiler_params=pltpu.CompilerParams(
            dimension_semantics=("parallel",)),
    )(ids_flat, emb_table, pe, gamma2, beta2)

    return out_flat.reshape(B, S, H)


# ------------------------- deterministic parameters ------------------------ #
def make_sinusoidal_pe(max_len: int, hidden: int) -> jnp.ndarray:
    """Standard 'Attention Is All You Need' sinusoidal table, shape (max_len, H)."""
    pos = jnp.arange(max_len, dtype=jnp.float32)[:, None]          # (L, 1)
    i = jnp.arange(0, hidden, 2, dtype=jnp.float32)                # (H/2,)
    div = jnp.exp(-jnp.log(10000.0) * i / hidden)                  # (H/2,)
    angles = pos * div[None, :]                                    # (L, H/2)
    pe = jnp.zeros((max_len, hidden), dtype=jnp.float32)
    pe = pe.at[:, 0::2].set(jnp.sin(angles))
    pe = pe.at[:, 1::2].set(jnp.cos(angles))
    return pe


# --------------------------- pure-JAX reference ---------------------------- #
def reference(input_ids, emb_table, pe_table, gamma, beta, eps=1e-12):
    x = emb_table[input_ids] + pe_table[: input_ids.shape[1], :][None]
    mean = jnp.mean(x, -1, keepdims=True)
    var = jnp.mean((x - mean) ** 2, -1, keepdims=True)
    return (x - mean) * lax.rsqrt(var + eps) * gamma + beta


if __name__ == "__main__":
    # Small config: vocab=64, hidden=32, batch=2, seq=8, pad_token_id=0.
    V, H, B, S = 64, 32, 2, 8
    PAD_ID = 0
    INIT_RANGE = 0.02
    EPS = 1e-12

    key = jax.random.PRNGKey(0)
    k_emb, k_ids = jax.random.split(key)

    # nn.Embedding weight ~ N(0, initializer_range), pad row zeroed.
    emb_table = INIT_RANGE * jax.random.normal(k_emb, (V, H), dtype=jnp.float32)
    emb_table = emb_table.at[PAD_ID].set(0.0)

    pe_table = make_sinusoidal_pe(max_len=16, hidden=H)
    gamma = jnp.ones((H,), dtype=jnp.float32)
    beta = jnp.zeros((H,), dtype=jnp.float32)

    input_ids = jax.random.randint(k_ids, (B, S), 0, V, dtype=jnp.int32)
    # TODO(synk): custom position_ids argument not plumbed; default arange(S) used.

    out = transformer_embeddings(input_ids, emb_table, pe_table, gamma, beta, eps=EPS)
    out = jax.block_until_ready(out)

    ref = reference(input_ids, emb_table, pe_table, gamma, beta, eps=EPS)
    assert out.shape == (B, S, H)
    assert jnp.allclose(out, ref, atol=1e-5, rtol=1e-5), "mismatch vs reference"

    print("KERNEL_OK")
</pallas_src>

<mosaic_0001>
module attributes {stable_mosaic.version = 11 : i64} {
  func.func @_embeddings_kernel(%arg0: i32, %arg1: memref<16xi32, #tpu.memory_space<smem>>, %arg2: memref<64x32xf32, #tpu.memory_space<any>>, %arg3: memref<8x32xf32, #tpu.memory_space<vmem>>, %arg4: memref<1x32xf32, #tpu.memory_space<vmem>>, %arg5: memref<1x32xf32, #tpu.memory_space<vmem>>, %arg6: memref<8x32xf32, #tpu.memory_space<vmem>>, %arg7: memref<8x32xf32, #tpu.memory_space<vmem>>, %arg8: memref<8x!tpu.dma_semaphore, #tpu.memory_space<semaphore_mem>>) attributes {dimension_semantics = [#tpu.dimension_semantics<parallel>], iteration_bounds = array<i64: 2>, scalar_prefetch = 1 : i64, scratch_operands = 2 : i64, tpu.core_type = #tpu.core_type<tc>, window_params = [{}, {transform_indices = @transform_1, window_bounds = array<i64: 8, 32>}, {pipeline_mode = #tpu.pipeline_mode<synchronous>, transform_indices = @transform_2, window_bounds = array<i64: 1, 32>}, {pipeline_mode = #tpu.pipeline_mode<synchronous>, transform_indices = @transform_3, window_bounds = array<i64: 1, 32>}, {transform_indices = @transform_4, window_bounds = array<i64: 8, 32>}]} {
    %c8_i32 = arith.constant 8 : i32
    %0 = arith.muli %arg0, %c8_i32 : i32
    %c0_i32 = arith.constant 0 : i32
    %1 = arith.addi %0, %c0_i32 : i32
    %2 = arith.index_cast %1 : i32 to index
    %3 = memref.load %arg1[%2] : memref<16xi32, #tpu.memory_space<smem>>
    %c0_i32_0 = arith.constant 0 : i32
    %c0_i32_1 = arith.constant 0 : i32
    %4 = tpu.memref_slice %arg2[%3, %c0_i32_1] : memref<64x32xf32, #tpu.memory_space<any>> -> memref<1x32xf32, #tpu.memory_space<any>>
    %c0_i32_2 = arith.constant 0 : i32
    %c0_i32_3 = arith.constant 0 : i32
    %5 = tpu.memref_slice %arg7[%c0_i32_2, %c0_i32_3] : memref<8x32xf32, #tpu.memory_space<vmem>> -> memref<1x32xf32, #tpu.memory_space<vmem>>
    %6 = tpu.memref_slice %arg8[%c0_i32_0] : memref<8x!tpu.dma_semaphore, #tpu.memory_space<semaphore_mem>> -> memref<1x!tpu.dma_semaphore, #tpu.memory_space<semaphore_mem>>
    %7 = tpu.memref_squeeze %6 : memref<1x!tpu.dma_semaphore, #tpu.memory_space<semaphore_mem>> -> memref<!tpu.dma_semaphore, #tpu.memory_space<semaphore_mem>>
    tpu.enqueue_dma source(%4 : memref<1x32xf32, #tpu.memory_space<any>>) target(%5 : memref<1x32xf32, #tpu.memory_space<vmem>>) target_semaphore(%7 : memref<!tpu.dma_semaphore, #tpu.memory_space<semaphore_mem>>)
    %c1_i32 = arith.constant 1 : i32
    %8 = arith.addi %0, %c1_i32 : i32
    %9 = arith.index_cast %8 : i32 to index
    %10 = memref.load %arg1[%9] : memref<16xi32, #tpu.memory_space<smem>>
    %c1_i32_4 = arith.constant 1 : i32
    %c0_i32_5 = arith.constant 0 : i32
    %11 = tpu.memref_slice %arg2[%10, %c0_i32_5] : memref<64x32xf32, #tpu.memory_space<any>> -> memref<1x32xf32, #tpu.memory_space<any>>
    %c1_i32_6 = arith.constant 1 : i32
    %c0_i32_7 = arith.constant 0 : i32
    %12 = tpu.memref_slice %arg7[%c1_i32_6, %c0_i32_7] : memref<8x32xf32, #tpu.memory_space<vmem>> -> memref<1x32xf32, #tpu.memory_space<vmem>>
    %13 = tpu.memref_slice %arg8[%c1_i32_4] : memref<8x!tpu.dma_semaphore, #tpu.memory_space<semaphore_mem>> -> memref<1x!tpu.dma_semaphore, #tpu.memory_space<semaphore_mem>>
    %14 = tpu.memref_squeeze %13 : memref<1x!tpu.dma_semaphore, #tpu.memory_space<semaphore_mem>> -> memref<!tpu.dma_semaphore, #tpu.memory_space<semaphore_mem>>
    tpu.enqueue_dma source(%11 : memref<1x32xf32, #tpu.memory_space<any>>) target(%12 : memref<1x32xf32, #tpu.memory_space<vmem>>) target_semaphore(%14 : memref<!tpu.dma_semaphore, #tpu.memory_space<semaphore_mem>>)
    %c2_i32 = arith.constant 2 : i32
    %15 = arith.addi %0, %c2_i32 : i32
    %16 = arith.index_cast %15 : i32 to index
    %17 = memref.load %arg1[%16] : memref<16xi32, #tpu.memory_space<smem>>
    %c2_i32_8 = arith.constant 2 : i32
    %c0_i32_9 = arith.constant 0 : i32
    %18 = tpu.memref_slice %arg2[%17, %c0_i32_9] : memref<64x32xf32, #tpu.memory_space<any>> -> memref<1x32xf32, #tpu.memory_space<any>>
    %c2_i32_10 = arith.constant 2 : i32
    %c0_i32_11 = arith.constant 0 : i32
    %19 = tpu.memref_slice %arg7[%c2_i32_10, %c0_i32_11] : memref<8x32xf32, #tpu.memory_space<vmem>> -> memref<1x32xf32, #tpu.memory_space<vmem>>
    %20 = tpu.memref_slice %arg8[%c2_i32_8] : memref<8x!tpu.dma_semaphore, #tpu.memory_space<semaphore_mem>> -> memref<1x!tpu.dma_semaphore, #tpu.memory_space<semaphore_mem>>
    %21 = tpu.memref_squeeze %20 : memref<1x!tpu.dma_semaphore, #tpu.memory_space<semaphore_mem>> -> memref<!tpu.dma_semaphore, #tpu.memory_space<semaphore_mem>>
    tpu.enqueue_dma source(%18 : memref<1x32xf32, #tpu.memory_space<any>>) target(%19 : memref<1x32xf32, #tpu.memory_space<vmem>>) target_semaphore(%21 : memref<!tpu.dma_semaphore, #tpu.memory_space<semaphore_mem>>)
    %c3_i32 = arith.constant 3 : i32
    %22 = arith.addi %0, %c3_i32 : i32
    %23 = arith.index_cast %22 : i32 to index
    %24 = memref.load %arg1[%23] : memref<16xi32, #tpu.memory_space<smem>>
    %c3_i32_12 = arith.constant 3 : i32
    %c0_i32_13 = arith.constant 0 : i32
    %25 = tpu.memref_slice %arg2[%24, %c0_i32_13] : memref<64x32xf32, #tpu.memory_space<any>> -> memref<1x32xf32, #tpu.memory_space<any>>
    %c3_i32_14 = arith.constant 3 : i32
    %c0_i32_15 = arith.constant 0 : i32
    %26 = tpu.memref_slice %arg7[%c3_i32_14, %c0_i32_15] : memref<8x32xf32, #tpu.memory_space<vmem>> -> memref<1x32xf32, #tpu.memory_space<vmem>>
    %27 = tpu.memref_slice %arg8[%c3_i32_12] : memref<8x!tpu.dma_semaphore, #tpu.memory_space<semaphore_mem>> -> memref<1x!tpu.dma_semaphore, #tpu.memory_space<semaphore_mem>>
    %28 = tpu.memref_squeeze %27 : memref<1x!tpu.dma_semaphore, #tpu.memory_space<semaphore_mem>> -> memref<!tpu.dma_semaphore, #tpu.memory_space<semaphore_mem>>
    tpu.enqueue_dma source(%25 : memref<1x32xf32, #tpu.memory_space<any>>) target(%26 : memref<1x32xf32, #tpu.memory_space<vmem>>) target_semaphore(%28 : memref<!tpu.dma_semaphore, #tpu.memory_space<semaphore_mem>>)
    %c4_i32 = arith.constant 4 : i32
    %29 = arith.addi %0, %c4_i32 : i32
    %30 = arith.index_cast %29 : i32 to index
    %31 = memref.load %arg1[%30] : memref<16xi32, #tpu.memory_space<smem>>
    %c4_i32_16 = arith.constant 4 : i32
    %c0_i32_17 = arith.constant 0 : i32
    %32 = tpu.memref_slice %arg2[%31, %c0_i32_17] : memref<64x32xf32, #tpu.memory_space<any>> -> memref<1x32xf32, #tpu.memory_space<any>>
    %c4_i32_18 = arith.constant 4 : i32
    %c0_i32_19 = arith.constant 0 : i32
    %33 = tpu.memref_slice %arg7[%c4_i32_18, %c0_i32_19] : memref<8x32xf32, #tpu.memory_space<vmem>> -> memref<1x32xf32, #tpu.memory_space<vmem>>
    %34 = tpu.memref_slice %arg8[%c4_i32_16] : memref<8x!tpu.dma_semaphore, #tpu.memory_space<semaphore_mem>> -> memref<1x!tpu.dma_semaphore, #tpu.memory_space<semaphore_mem>>
    %35 = tpu.memref_squeeze %34 : memref<1x!tpu.dma_semaphore, #tpu.memory_space<semaphore_mem>> -> memref<!tpu.dma_semaphore, #tpu.memory_space<semaphore_mem>>
    tpu.enqueue_dma source(%32 : memref<1x32xf32, #tpu.memory_space<any>>) target(%33 : memref<1x32xf32, #tpu.memory_space<vmem>>) target_semaphore(%35 : memref<!tpu.dma_semaphore, #tpu.memory_space<semaphore_mem>>)
    %c5_i32 = arith.constant 5 : i32
    %36 = arith.addi %0, %c5_i32 : i32
    %37 = arith.index_cast %36 : i32 to index
    %38 = memref.load %arg1[%37] : memref<16xi32, #tpu.memory_space<smem>>
    %c5_i32_20 = arith.constant 5 : i32
    %c0_i32_21 = arith.constant 0 : i32
    %39 = tpu.memref_slice %arg2[%38, %c0_i32_21] : memref<64x32xf32, #tpu.memory_space<any>> -> memref<1x32xf32, #tpu.memory_space<any>>
    %c5_i32_22 = arith.constant 5 : i32
    %c0_i32_23 = arith.constant 0 : i32
    %40 = tpu.memref_slice %arg7[%c5_i32_22, %c0_i32_23] : memref<8x32xf32, #tpu.memory_space<vmem>> -> memref<1x32xf32, #tpu.memory_space<vmem>>
    %41 = tpu.memref_slice %arg8[%c5_i32_20] : memref<8x!tpu.dma_semaphore, #tpu.memory_space<semaphore_mem>> -> memref<1x!tpu.dma_semaphore, #tpu.memory_space<semaphore_mem>>
    %42 = tpu.memref_squeeze %41 : memref<1x!tpu.dma_semaphore, #tpu.memory_space<semaphore_mem>> -> memref<!tpu.dma_semaphore, #tpu.memory_space<semaphore_mem>>
    tpu.enqueue_dma source(%39 : memref<1x32xf32, #tpu.memory_space<any>>) target(%40 : memref<1x32xf32, #tpu.memory_space<vmem>>) target_semaphore(%42 : memref<!tpu.dma_semaphore, #tpu.memory_space<semaphore_mem>>)
    %c6_i32 = arith.constant 6 : i32
    %43 = arith.addi %0, %c6_i32 : i32
    %44 = arith.index_cast %43 : i32 to index
    %45 = memref.load %arg1[%44] : memref<16xi32, #tpu.memory_space<smem>>
    %c6_i32_24 = arith.constant 6 : i32
    %c0_i32_25 = arith.constant 0 : i32
    %46 = tpu.memref_slice %arg2[%45, %c0_i32_25] : memref<64x32xf32, #tpu.memory_space<any>> -> memref<1x32xf32, #tpu.memory_space<any>>
    %c6_i32_26 = arith.constant 6 : i32
    %c0_i32_27 = arith.constant 0 : i32
    %47 = tpu.memref_slice %arg7[%c6_i32_26, %c0_i32_27] : memref<8x32xf32, #tpu.memory_space<vmem>> -> memref<1x32xf32, #tpu.memory_space<vmem>>
    %48 = tpu.memref_slice %arg8[%c6_i32_24] : memref<8x!tpu.dma_semaphore, #tpu.memory_space<semaphore_mem>> -> memref<1x!tpu.dma_semaphore, #tpu.memory_space<semaphore_mem>>
    %49 = tpu.memref_squeeze %48 : memref<1x!tpu.dma_semaphore, #tpu.memory_space<semaphore_mem>> -> memref<!tpu.dma_semaphore, #tpu.memory_space<semaphore_mem>>
    tpu.enqueue_dma source(%46 : memref<1x32xf32, #tpu.memory_space<any>>) target(%47 : memref<1x32xf32, #tpu.memory_space<vmem>>) target_semaphore(%49 : memref<!tpu.dma_semaphore, #tpu.memory_space<semaphore_mem>>)
    %c7_i32 = arith.constant 7 : i32
    %50 = arith.addi %0, %c7_i32 : i32
    %51 = arith.index_cast %50 : i32 to index
    %52 = memref.load %arg1[%51] : memref<16xi32, #tpu.memory_space<smem>>
    %c7_i32_28 = arith.constant 7 : i32
    %c0_i32_29 = arith.constant 0 : i32
    %53 = tpu.memref_slice %arg2[%52, %c0_i32_29] : memref<64x32xf32, #tpu.memory_space<any>> -> memref<1x32xf32, #tpu.memory_space<any>>
    %c7_i32_30 = arith.constant 7 : i32
    %c0_i32_31 = arith.constant 0 : i32
    %54 = tpu.memref_slice %arg7[%c7_i32_30, %c0_i32_31] : memref<8x32xf32, #tpu.memory_space<vmem>> -> memref<1x32xf32, #tpu.memory_space<vmem>>
    %55 = tpu.memref_slice %arg8[%c7_i32_28] : memref<8x!tpu.dma_semaphore, #tpu.memory_space<semaphore_mem>> -> memref<1x!tpu.dma_semaphore, #tpu.memory_space<semaphore_mem>>
    %56 = tpu.memref_squeeze %55 : memref<1x!tpu.dma_semaphore, #tpu.memory_space<semaphore_mem>> -> memref<!tpu.dma_semaphore, #tpu.memory_space<semaphore_mem>>
    tpu.enqueue_dma source(%53 : memref<1x32xf32, #tpu.memory_space<any>>) target(%54 : memref<1x32xf32, #tpu.memory_space<vmem>>) target_semaphore(%56 : memref<!tpu.dma_semaphore, #tpu.memory_space<semaphore_mem>>)
    %c0_i32_32 = arith.constant 0 : i32
    %c0_i32_33 = arith.constant 0 : i32
    %57 = tpu.memref_slice %arg2[%3, %c0_i32_33] : memref<64x32xf32, #tpu.memory_space<any>> -> memref<1x32xf32, #tpu.memory_space<any>>
    %c0_i32_34 = arith.constant 0 : i32
    %c0_i32_35 = arith.constant 0 : i32
    %58 = tpu.memref_slice %arg7[%c0_i32_34, %c0_i32_35] : memref<8x32xf32, #tpu.memory_space<vmem>> -> memref<1x32xf32, #tpu.memory_space<vmem>>
    %59 = tpu.memref_slice %arg8[%c0_i32_32] : memref<8x!tpu.dma_semaphore, #tpu.memory_space<semaphore_mem>> -> memref<1x!tpu.dma_semaphore, #tpu.memory_space<semaphore_mem>>
    %60 = tpu.memref_squeeze %59 : memref<1x!tpu.dma_semaphore, #tpu.memory_space<semaphore_mem>> -> memref<!tpu.dma_semaphore, #tpu.memory_space<semaphore_mem>>
    tpu.wait_dma2 semaphore(%60 : memref<!tpu.dma_semaphore, #tpu.memory_space<semaphore_mem>>) src(%57 : memref<1x32xf32, #tpu.memory_space<any>>) dst(%58 : memref<1x32xf32, #tpu.memory_space<vmem>>)
    %c1_i32_36 = arith.constant 1 : i32
    %c0_i32_37 = arith.constant 0 : i32
    %61 = tpu.memref_slice %arg2[%10, %c0_i32_37] : memref<64x32xf32, #tpu.memory_space<any>> -> memref<1x32xf32, #tpu.memory_space<any>>
    %c1_i32_38 = arith.constant 1 : i32
    %c0_i32_39 = arith.constant 0 : i32
    %62 = tpu.memref_slice %arg7[%c1_i32_38, %c0_i32_39] : memref<8x32xf32, #tpu.memory_space<vmem>> -> memref<1x32xf32, #tpu.memory_space<vmem>>
    %63 = tpu.memref_slice %arg8[%c1_i32_36] : memref<8x!tpu.dma_semaphore, #tpu.memory_space<semaphore_mem>> -> memref<1x!tpu.dma_semaphore, #tpu.memory_space<semaphore_mem>>
    %64 = tpu.memref_squeeze %63 : memref<1x!tpu.dma_semaphore, #tpu.memory_space<semaphore_mem>> -> memref<!tpu.dma_semaphore, #tpu.memory_space<semaphore_mem>>
    tpu.wait_dma2 semaphore(%64 : memref<!tpu.dma_semaphore, #tpu.memory_space<semaphore_mem>>) src(%61 : memref<1x32xf32, #tpu.memory_space<any>>) dst(%62 : memref<1x32xf32, #tpu.memory_space<vmem>>)
    %c2_i32_40 = arith.constant 2 : i32
    %c0_i32_41 = arith.constant 0 : i32
    %65 = tpu.memref_slice %arg2[%17, %c0_i32_41] : memref<64x32xf32, #tpu.memory_space<any>> -> memref<1x32xf32, #tpu.memory_space<any>>
    %c2_i32_42 = arith.constant 2 : i32
    %c0_i32_43 = arith.constant 0 : i32
    %66 = tpu.memref_slice %arg7[%c2_i32_42, %c0_i32_43] : memref<8x32xf32, #tpu.memory_space<vmem>> -> memref<1x32xf32, #tpu.memory_space<vmem>>
    %67 = tpu.memref_slice %arg8[%c2_i32_40] : memref<8x!tpu.dma_semaphore, #tpu.memory_space<semaphore_mem>> -> memref<1x!tpu.dma_semaphore, #tpu.memory_space<semaphore_mem>>
    %68 = tpu.memref_squeeze %67 : memref<1x!tpu.dma_semaphore, #tpu.memory_space<semaphore_mem>> -> memref<!tpu.dma_semaphore, #tpu.memory_space<semaphore_mem>>
    tpu.wait_dma2 semaphore(%68 : memref<!tpu.dma_semaphore, #tpu.memory_space<semaphore_mem>>) src(%65 : memref<1x32xf32, #tpu.memory_space<any>>) dst(%66 : memref<1x32xf32, #tpu.memory_space<vmem>>)
    %c3_i32_44 = arith.constant 3 : i32
    %c0_i32_45 = arith.constant 0 : i32
    %69 = tpu.memref_slice %arg2[%24, %c0_i32_45] : memref<64x32xf32, #tpu.memory_space<any>> -> memref<1x32xf32, #tpu.memory_space<any>>
    %c3_i32_46 = arith.constant 3 : i32
    %c0_i32_47 = arith.constant 0 : i32
    %70 = tpu.memref_slice %arg7[%c3_i32_46, %c0_i32_47] : memref<8x32xf32, #tpu.memory_space<vmem>> -> memref<1x32xf32, #tpu.memory_space<vmem>>
    %71 = tpu.memref_slice %arg8[%c3_i32_44] : memref<8x!tpu.dma_semaphore, #tpu.memory_space<semaphore_mem>> -> memref<1x!tpu.dma_semaphore, #tpu.memory_space<semaphore_mem>>
    %72 = tpu.memref_squeeze %71 : memref<1x!tpu.dma_semaphore, #tpu.memory_space<semaphore_mem>> -> memref<!tpu.dma_semaphore, #tpu.memory_space<semaphore_mem>>
    tpu.wait_dma2 semaphore(%72 : memref<!tpu.dma_semaphore, #tpu.memory_space<semaphore_mem>>) src(%69 : memref<1x32xf32, #tpu.memory_space<any>>) dst(%70 : memref<1x32xf32, #tpu.memory_space<vmem>>)
    %c4_i32_48 = arith.constant 4 : i32
    %c0_i32_49 = arith.constant 0 : i32
    %73 = tpu.memref_slice %arg2[%31, %c0_i32_49] : memref<64x32xf32, #tpu.memory_space<any>> -> memref<1x32xf32, #tpu.memory_space<any>>
    %c4_i32_50 = arith.constant 4 : i32
    %c0_i32_51 = arith.constant 0 : i32
    %74 = tpu.memref_slice %arg7[%c4_i32_50, %c0_i32_51] : memref<8x32xf32, #tpu.memory_space<vmem>> -> memref<1x32xf32, #tpu.memory_space<vmem>>
    %75 = tpu.memref_slice %arg8[%c4_i32_48] : memref<8x!tpu.dma_semaphore, #tpu.memory_space<semaphore_mem>> -> memref<1x!tpu.dma_semaphore, #tpu.memory_space<semaphore_mem>>
    %76 = tpu.memref_squeeze %75 : memref<1x!tpu.dma_semaphore, #tpu.memory_space<semaphore_mem>> -> memref<!tpu.dma_semaphore, #tpu.memory_space<semaphore_mem>>
    tpu.wait_dma2 semaphore(%76 : memref<!tpu.dma_semaphore, #tpu.memory_space<semaphore_mem>>) src(%73 : memref<1x32xf32, #tpu.memory_space<any>>) dst(%74 : memref<1x32xf32, #tpu.memory_space<vmem>>)
    %c5_i32_52 = arith.constant 5 : i32
    %c0_i32_53 = arith.constant 0 : i32
    %77 = tpu.memref_slice %arg2[%38, %c0_i32_53] : memref<64x32xf32, #tpu.memory_space<any>> -> memref<1x32xf32, #tpu.memory_space<any>>
    %c5_i32_54 = arith.constant 5 : i32
    %c0_i32_55 = arith.constant 0 : i32
    %78 = tpu.memref_slice %arg7[%c5_i32_54, %c0_i32_55] : memref<8x32xf32, #tpu.memory_space<vmem>> -> memref<1x32xf32, #tpu.memory_space<vmem>>
    %79 = tpu.memref_slice %arg8[%c5_i32_52] : memref<8x!tpu.dma_semaphore, #tpu.memory_space<semaphore_mem>> -> memref<1x!tpu.dma_semaphore, #tpu.memory_space<semaphore_mem>>
    %80 = tpu.memref_squeeze %79 : memref<1x!tpu.dma_semaphore, #tpu.memory_space<semaphore_mem>> -> memref<!tpu.dma_semaphore, #tpu.memory_space<semaphore_mem>>
    tpu.wait_dma2 semaphore(%80 : memref<!tpu.dma_semaphore, #tpu.memory_space<semaphore_mem>>) src(%77 : memref<1x32xf32, #tpu.memory_space<any>>) dst(%78 : memref<1x32xf32, #tpu.memory_space<vmem>>)
    %c6_i32_56 = arith.constant 6 : i32
    %c0_i32_57 = arith.constant 0 : i32
    %81 = tpu.memref_slice %arg2[%45, %c0_i32_57] : memref<64x32xf32, #tpu.memory_space<any>> -> memref<1x32xf32, #tpu.memory_space<any>>
    %c6_i32_58 = arith.constant 6 : i32
    %c0_i32_59 = arith.constant 0 : i32
    %82 = tpu.memref_slice %arg7[%c6_i32_58, %c0_i32_59] : memref<8x32xf32, #tpu.memory_space<vmem>> -> memref<1x32xf32, #tpu.memory_space<vmem>>
    %83 = tpu.memref_slice %arg8[%c6_i32_56] : memref<8x!tpu.dma_semaphore, #tpu.memory_space<semaphore_mem>> -> memref<1x!tpu.dma_semaphore, #tpu.memory_space<semaphore_mem>>
    %84 = tpu.memref_squeeze %83 : memref<1x!tpu.dma_semaphore, #tpu.memory_space<semaphore_mem>> -> memref<!tpu.dma_semaphore, #tpu.memory_space<semaphore_mem>>
    tpu.wait_dma2 semaphore(%84 : memref<!tpu.dma_semaphore, #tpu.memory_space<semaphore_mem>>) src(%81 : memref<1x32xf32, #tpu.memory_space<any>>) dst(%82 : memref<1x32xf32, #tpu.memory_space<vmem>>)
    %c7_i32_60 = arith.constant 7 : i32
    %c0_i32_61 = arith.constant 0 : i32
    %85 = tpu.memref_slice %arg2[%52, %c0_i32_61] : memref<64x32xf32, #tpu.memory_space<any>> -> memref<1x32xf32, #tpu.memory_space<any>>
    %c7_i32_62 = arith.constant 7 : i32
    %c0_i32_63 = arith.constant 0 : i32
    %86 = tpu.memref_slice %arg7[%c7_i32_62, %c0_i32_63] : memref<8x32xf32, #tpu.memory_space<vmem>> -> memref<1x32xf32, #tpu.memory_space<vmem>>
    %87 = tpu.memref_slice %arg8[%c7_i32_60] : memref<8x!tpu.dma_semaphore, #tpu.memory_space<semaphore_mem>> -> memref<1x!tpu.dma_semaphore, #tpu.memory_space<semaphore_mem>>
    %88 = tpu.memref_squeeze %87 : memref<1x!tpu.dma_semaphore, #tpu.memory_space<semaphore_mem>> -> memref<!tpu.dma_semaphore, #tpu.memory_space<semaphore_mem>>
    tpu.wait_dma2 semaphore(%88 : memref<!tpu.dma_semaphore, #tpu.memory_space<semaphore_mem>>) src(%85 : memref<1x32xf32, #tpu.memory_space<any>>) dst(%86 : memref<1x32xf32, #tpu.memory_space<vmem>>)
    %c0 = arith.constant 0 : index
    %c0_64 = arith.constant 0 : index
    %89 = vector.load %arg7[%c0, %c0_64] : memref<8x32xf32, #tpu.memory_space<vmem>>, vector<8x32xf32>
    %c0_65 = arith.constant 0 : index
    %c0_66 = arith.constant 0 : index
    %90 = vector.load %arg3[%c0_65, %c0_66] : memref<8x32xf32, #tpu.memory_space<vmem>>, vector<8x32xf32>
    %91 = arith.addf %89, %90 : vector<8x32xf32>
    %cst = arith.constant dense<0.000000e+00> : vector<8xf32>
    %92 = vector.multi_reduction <add>, %91, %cst [1] : vector<8x32xf32> to vector<8xf32>
    %93 = vector.shape_cast %92 : vector<8xf32> to vector<8x1xf32>
    %cst_67 = arith.constant 3.200000e+01 : f32
    %94 = vector.broadcast %cst_67 : f32 to vector<8x1xf32>
    %95 = arith.divf %93, %94 : vector<8x1xf32>
    %96 = vector.broadcast %95 : vector<8x1xf32> to vector<8x32xf32>
    %97 = arith.subf %91, %96 : vector<8x32xf32>
    %98 = arith.mulf %97, %97 : vector<8x32xf32>
    %cst_68 = arith.constant dense<0.000000e+00> : vector<8xf32>
    %99 = vector.multi_reduction <add>, %98, %cst_68 [1] : vector<8x32xf32> to vector<8xf32>
    %100 = vector.shape_cast %99 : vector<8xf32> to vector<8x1xf32>
    %cst_69 = arith.constant 3.200000e+01 : f32
    %101 = vector.broadcast %cst_69 : f32 to vector<8x1xf32>
    %102 = arith.divf %100, %101 : vector<8x1xf32>
    %103 = vector.broadcast %95 : vector<8x1xf32> to vector<8x32xf32>
    %104 = arith.subf %91, %103 : vector<8x32xf32>
    %cst_70 = arith.constant 9.99999996E-13 : f32
    %105 = vector.broadcast %cst_70 : f32 to vector<8x1xf32>
    %106 = arith.addf %102, %105 : vector<8x1xf32>
    %107 = math.rsqrt %106 : vector<8x1xf32>
    %108 = vector.broadcast %107 : vector<8x1xf32> to vector<8x32xf32>
    %109 = arith.mulf %104, %108 : vector<8x32xf32>
    %c0_71 = arith.constant 0 : index
    %c0_72 = arith.constant 0 : index
    %110 = vector.load %arg4[%c0_71, %c0_72] : memref<1x32xf32, #tpu.memory_space<vmem>>, vector<1x32xf32>
    %111 = vector.broadcast %110 : vector<1x32xf32> to vector<8x32xf32>
    %112 = arith.mulf %109, %111 : vector<8x32xf32>
    %c0_73 = arith.constant 0 : index
    %c0_74 = arith.constant 0 : index
    %113 = vector.load %arg5[%c0_73, %c0_74] : memref<1x32xf32, #tpu.memory_space<vmem>>, vector<1x32xf32>
    %114 = vector.broadcast %113 : vector<1x32xf32> to vector<8x32xf32>
    %115 = arith.addf %112, %114 : vector<8x32xf32>
    %c0_75 = arith.constant 0 : index
    %c0_76 = arith.constant 0 : index
    %116 = vector.load %arg6[%c0_75, %c0_76] : memref<8x32xf32, #tpu.memory_space<vmem>>, vector<8x32xf32>
    tpu.vector_store %arg6[%c0_75, %c0_76], %115 {strides = array<i32>} : memref<8x32xf32, #tpu.memory_space<vmem>>, vector<8x32xf32>,
    return
  }
  func.func @transform_1(%arg0: i32, %arg1: memref<16xi32, #tpu.memory_space<smem>>) -> (i32, i32) {
    %c1_i32 = arith.constant 1 : i32
    %c0_i32 = arith.constant 0 : i32
    %0 = arith.cmpi eq, %c1_i32, %c0_i32 : i32
    %c1_i32_0 = arith.constant 1 : i32
    %1 = arith.select %0, %c1_i32_0, %c1_i32 : i32
    %2 = arith.remsi %arg0, %1 : i32
    %c0_i32_1 = arith.constant 0 : i32
    %3 = arith.cmpi ne, %2, %c0_i32_1 : i32
    %c0_i32_2 = arith.constant 0 : i32
    %4 = arith.cmpi slt, %2, %c0_i32_2 : i32
    %c0_i32_3 = arith.constant 0 : i32
    %5 = arith.cmpi slt, %1, %c0_i32_3 : i32
    %6 = arith.xori %4, %5 : i1
    %7 = arith.andi %6, %3 : i1
    %8 = arith.addi %2, %1 : i32
    %9 = arith.select %7, %8, %2 : i32
    %c0_i32_4 = arith.constant 0 : i32
    %c0_i32_5 = arith.constant 0 : i32
    return %9, %c0_i32_4 : i32, i32
  }
  func.func @transform_2(%arg0: i32, %arg1: memref<16xi32, #tpu.memory_space<smem>>) -> (i32, i32) {
    %c0_i32 = arith.constant 0 : i32
    %c0_i32_0 = arith.constant 0 : i32
    %c0_i32_1 = arith.constant 0 : i32
    return %c0_i32, %c0_i32_0 : i32, i32
  }
  func.func @transform_3(%arg0: i32, %arg1: memref<16xi32, #tpu.memory_space<smem>>) -> (i32, i32) {
    %c0_i32 = arith.constant 0 : i32
    %c0_i32_0 = arith.constant 0 : i32
    %c0_i32_1 = arith.constant 0 : i32
    return %c0_i32, %c0_i32_0 : i32, i32
  }
  func.func @transform_4(%arg0: i32, %arg1: memref<16xi32, #tpu.memory_space<smem>>) -> (i32, i32) {
    %c0_i32 = arith.constant 0 : i32
    %c0_i32_0 = arith.constant 0 : i32
    return %arg0, %c0_i32 : i32, i32
  }
}

</mosaic_0001>

<bundles_post_ra>
// kernel: tpu_custom_call.1
= control target key start
LH: loop header
LB: loop body
LE: loop exit
PB: predicated region body
PF: predicated region fallthrough
CT: control target
= control target key end

     0   :  { %s1153_s0 = inlined_call_operand.vmem [shape: s32[16], index: 0, kind: input, shape index: {}]   ;;  %s1154_s1 = inlined_call_operand.vmem [shape: f32[64,32], index: 1, kind: input, shape index: {}]   ;;  %s1155_s2 = inlined_call_operand.vmem [shape: f32[8,32], index: 2, kind: input, shape index: {}]   ;;  %s1156_s3 = inlined_call_operand.vmem [shape: f32[1,32], index: 3, kind: input, shape index: {}]   ;;  %s1157_s4 = inlined_call_operand.vmem [shape: f32[1,32], index: 4, kind: input, shape index: {}]   ;;  %s1158_s5 = inlined_call_operand.hbm [shape: f32[16,32], index: 5, kind: output, shape index: {}]  }
   0x1   :  { %s10_s20 = sshll.u32 %s1153_s0, 4  ;;  %s11_s20 = int_to_ptr.vmem [resolvable:$true] %s10_s20 }
   0x2   :  { %s871_s21 = scalar_lea.vmem %s11_s20, 16  ;;  %p876_p1 = scmp.lt.s32.totalorder %s11_s20, %s11_s20 }
   0x3   :  { %p872_p0 = scmp.ne.s32.totalorder %s11_s20, %s871_s21  ;;  %p877_p2 = scmp.lt.s32.totalorder %s871_s21, %s871_s21 }
   0x5   :  { %p878_p3 = por %p877_p2, %p876_p1 }
   0x7   :  { %p879_p4 = pnand %p878_p3, %p872_p0 }
   0x9   :  { %882 = shalt.err (!%p879_p4)  }
   0xa   :  { %s965_s22 = smov [#allocation5]  }
   0xb   :  { %13 = dma.vmem_to_smem %s11_s20, 16, %s965_s22, [#allocation4] }
   0xc   :  { %927 = dma.done.wait [#allocation4], 16 }
   0xd   :  { %928 = vsyncadd [#allocation4], 4294967280 }
   0xe   :  { %15 = sfence }
   0xf   :  { %16 = vsyncpa [#allocation7], 0 }
  0x10   :  { %18 = vsyncpa [#allocation7 + $0x1], 0  ;;  %s1000_s23 = smov 0   ;;  %s1002_s24 = smov 0  }
  0x11   :  { %s1004_s0 = smov 0   ;;  %s1006_s25 = smov 0  }
  0x12 LB: > { %s1021_s26 = sadd.s32 4294967295, %s963_s25   ;;  %s810_s27 = sadd.s32 4294967294, %s963_s25   ;;  %s963_s25 = sphi %s1006_s25, %s1164_s25   ;;  %s959_s0 = sphi %s1004_s0, %s1163_s0   ;;  %s955_s24 = sphi %s1002_s24, %s1162_s24   ;;  %s951_s23 = sphi %s1000_s23, %s1161_s23  }
  0x13   : > { %s1025_s28 = sadd.s32 1, %s963_s25   ;;  %s94_s29 = sadd.s32 1, %s959_s0 }
  0x14   : > { %s91_s30 = ssub.s32 %s963_s25, %s1025_s28  ;;  %p104_p5 = scmp.ne.s32.totalorder %s959_s0, %s955_s24 }
  0x15   : > { %p92_p6 = scmp.eq.s32.totalorder %s91_s30, 0  ;;  %p105_p7 = scmp.eq.s32.totalorder %s1021_s26, 1 }
  0x16   : > { %p110_p8 = scmp.ne.s32.totalorder %s955_s24, %s951_s23  ;;  %p111_p9 = scmp.eq.s32.totalorder %s810_s27, 1 }
  0x17   : > { %s1036_s6 = scalar_select %p92_p6, %s959_s0, %s94_s29  }
  0x18   : > { %p1038_p10 = por %p105_p7, %p104_p5  ;;  %p1042_p11 = por %p111_p9, %p110_p8 }
  0x19   : > { %p812_p12 = scmp.ge.s32.totalorder %s963_s25, 1  ;;  %p138_p13 = scmp.lt.s32.totalorder %s963_s25, 3 }
  0x1b   : > { %p139_p0 = pnand %p812_p12, %p138_p13 }
  0x1c   : > { %s154_s9 = sand.u32 (!%p139_p0), 1, %s955_s24   ;;  %s1050_s10 = sshll.u32 (!%p139_p0), %s1021_s26, 3 }
  0x1d   : > { %142 = sbr.rel (%p139_p0) target bundleno = 456 (0x1c8), region = 32  ;;  %s1054_s11 = sshll.u32 (!%p139_p0), %s154_s9, 3 }
  0x1e   : > { %s158_s12 = sld [smem:[#allocation5 + %s1050_s10]] (!%p139_p0)  ;;  %s156_s16 = scalar_lea.vmem (!%p139_p0), [#allocation6], %s1054_s11 }
  0x24   : > { %s159_s15 = scalar_lea.vmem %s1154_s1, %s158_s12 }
  0x25   : > { %v177_v0 = vld [vmem:[%s159_s15] sm:$0x1] }
  0x26   : > { %178 = vst [vmem:[#allocation2] sm:$0x1] %v177_v0 }
  0x27   : > { %203 = vsyncadd [#allocation3], 16  ;;  %s204_s17 = sadd.s32 1, %s1050_s10 }
  0x28   : > { %s205_s18 = sld [smem:[#allocation5 + %s204_s17]] }
  0x2e   : > { %s206_s21 = scalar_lea.vmem %s1154_s1, %s205_s18 }
  0x2f   : > { %v226_v1 = vld [vmem:[%s206_s21] sm:$0x1] }
  0x30   : > { %227 = vst [vmem:[#allocation2 + $0x1] sm:$0x1] %v226_v1 }
  0x31   : > { %252 = vsyncadd [#allocation3 + $0x1], 16  ;;  %s253_s22 = sadd.s32 2, %s1050_s10 }
  0x32   : > { %s254_s27 = sld [smem:[#allocation5 + %s253_s22]] }
  0x38   : > { %s255_s12 = scalar_lea.vmem %s1154_s1, %s254_s27 }
  0x39   : > { %v275_v2 = vld [vmem:[%s255_s12] sm:$0x1] }
  0x3a   : > { %276 = vst [vmem:[#allocation2 + $0x2] sm:$0x1] %v275_v2 }
  0x3b   : > { %301 = vsyncadd [#allocation3 + $0x2], 16  ;;  %s302_s13 = sadd.s32 3, %s1050_s10 }
  0x3c   : > { %s303_s14 = sld [smem:[#allocation5 + %s302_s13]] }
  0x42   : > { %s304_s18 = scalar_lea.vmem %s1154_s1, %s303_s14 }
  0x43   : > { %v324_v3 = vld [vmem:[%s304_s18] sm:$0x1] }
  0x44   : > { %325 = vst [vmem:[#allocation2 + $0x3] sm:$0x1] %v324_v3 }
  0x45   : > { %350 = vsyncadd [#allocation3 + $0x3], 16  ;;  %s351_s19 = sadd.s32 4, %s1050_s10 }
  0x46   : > { %s352_s20 = sld [smem:[#allocation5 + %s351_s19]] }
  0x4c   : > { %s353_s27 = scalar_lea.vmem %s1154_s1, %s352_s20 }
  0x4d   : > { %v373_v4 = vld [vmem:[%s353_s27] sm:$0x1] }
  0x4e   : > { %374 = vst [vmem:[#allocation2 + $0x4] sm:$0x1] %v373_v4 }
  0x4f   : > { %399 = vsyncadd [#allocation3 + $0x4], 16  ;;  %s400_s29 = sadd.s32 5, %s1050_s10 }
  0x50   : > { %s401_s30 = sld [smem:[#allocation5 + %s400_s29]] }
  0x56   : > { %s402_s14 = scalar_lea.vmem %s1154_s1, %s401_s30 }
  0x57   : > { %v422_v5 = vld [vmem:[%s402_s14] sm:$0x1] }
  0x58   : > { %423 = vst [vmem:[#allocation2 + $0x5] sm:$0x1] %v422_v5 }
  0x59   : > { %448 = vsyncadd [#allocation3 + $0x5], 16  ;;  %s449_s15 = sadd.s32 6, %s1050_s10 }
  0x5a   : > { %s450_s17 = sld [smem:[#allocation5 + %s449_s15]] }
  0x60   : > { %s451_s20 = scalar_lea.vmem %s1154_s1, %s450_s17 }
  0x61   : > { %v471_v6 = vld [vmem:[%s451_s20] sm:$0x1] }
  0x62   : > { %472 = vst [vmem:[#allocation2 + $0x6] sm:$0x1] %v471_v6 }
  0x63   : > { %497 = vsyncadd [#allocation3 + $0x6], 16  ;;  %s498_s21 = sadd.s32 7, %s1050_s10 }
  0x64   : > { %s499_s22 = sld [smem:[#allocation5 + %s498_s21]] }
  0x6a   : > { %s500_s30 = scalar_lea.vmem %s1154_s1, %s499_s22 }
  0x6b   : > { %v520_v7 = vld [vmem:[%s500_s30] sm:$0x1] }
  0x6c   : > { %521 = vst [vmem:[#allocation2 + $0x7] sm:$0x1] %v520_v7 }
  0x6d   : > { %546 = vsyncadd [#allocation3 + $0x7], 16 }
  0x6e   : > { %929 = dma.done.wait [#allocation3], 16 }
  0x6f   : > { %930 = vsyncadd [#allocation3], 4294967280 }
  0x70   : > { %931 = dma.done.wait [#allocation3 + $0x1], 16 }
  0x71   : > { %932 = vsyncadd [#allocation3 + $0x1], 4294967280 }
  0x72   : > { %933 = dma.done.wait [#allocation3 + $0x2], 16 }
  0x73   : > { %934 = vsyncadd [#allocation3 + $0x2], 4294967280 }
  0x74   : > { %935 = dma.done.wait [#allocation3 + $0x3], 16 }
  0x75   : > { %936 = vsyncadd [#allocation3 + $0x3], 4294967280 }
  0x76   : > { %937 = dma.done.wait [#allocation3 + $0x4], 16 }
  0x77   : > { %938 = vsyncadd [#allocation3 + $0x4], 4294967280 }
  0x78   : > { %939 = dma.done.wait [#allocation3 + $0x5], 16 }
  0x79   : > { %940 = vsyncadd [#allocation3 + $0x5], 4294967280 }
  0x7a   : > { %941 = dma.done.wait [#allocation3 + $0x6], 16 }
  0x7b   : > { %942 = vsyncadd [#allocation3 + $0x6], 4294967280 }
  0x7c   : > { %943 = dma.done.wait [#allocation3 + $0x7], 16 }
  0x7d   : > { %944 = vsyncadd [#allocation3 + $0x7], 4294967280  ;;  %v564_v8 = vld [vmem:[#allocation2] sm:$0xff]  ;;  %vm567_vm0 = vcmask 261120   ;;  %s818_s18 = sshll.u32 %s1021_s26, 7  ;;  %s613_s19 = sshll.u32 %s156_s16, 4  ;;  %s1108_s19 = int_to_ptr.vmem [resolvable:$true] %s613_s19 }
  0x7e   : > { %v565_v9 = vld [vmem:[%s1155_s2] sm:$0xff]  ;;  %s1106_s22 = scalar_lea.hbm %s1158_s5, %s818_s18  ;;  %s600_s27 = scalar_lea.sflag [#allocation7], %s154_s9 }
  0x7f   : > { %v566_v10 = vadd.f32 %v565_v9, %v564_v8  ;;  %v815_v21 = vld [vmem:[%s1156_s3] ss:$0 sm:$0xff]  ;;  %s883_s26 = scalar_lea.vmem %s1108_s19, 128  ;;  %s966_s29 = smov [#allocation6]  }
  0x80   : > { %v816_v23 = vld [vmem:[%s1157_s4] ss:$0 sm:$0xff]  ;;  %p884_p1 = scmp.ne.s32.totalorder %s1108_s19, %s883_s26  ;;  %s887_s30 = sshll.u32 %s966_s29, 4  ;;  %s888_s30 = int_to_ptr.vmem [resolvable:$false] %s887_s30 }
  0x81   : > { %v568_v11 = vsel %vm567_vm0, %v566_v10, 0.0  ;;  %s889_s10 = scalar_lea.vmem %s888_s30, 256  ;;  %p890_p4 = scmp.lt.s32.totalorder %s1108_s19, %s888_s30 }
  0x82   : > { %569 = vadd.xlane.f32.xlu0 %v568_v11  ;;  %p885_p2 = pnand %p884_p1, %p1038_p10  ;;  %p891_p5 = scmp.lt.s32.totalorder %s889_s10, %s883_s26 }
  0x84   : > { %p886_p3 = pneg %p885_p2  ;;  %p892_p6 = por %p891_p5, %p890_p4 }
  0x86   : > { %p893_p7 = pnand %p892_p6, %p886_p3 }
 0x10f   : > { %v570_v12 = vpop.xlane.xlu0 %569 }
 0x110   : > { %v572_v13 = vmul.f32 0.03125, %v570_v12 }
 0x112   : > { %v573_v14 = vsub.f32 %v566_v10, %v572_v13 }
 0x114   : > { %v574_v15 = vmul.f32 %v573_v14, %v573_v14 }
 0x116   : > { %v575_v16 = vsel %vm567_vm0, %v574_v15, 0.0 }
 0x117   : > { %576 = vadd.xlane.f32.xlu0 %v575_v16 }
 0x1a4   : > { %v577_v17 = vpop.xlane.xlu0 %576 }
 0x1a5   : > { %v578_v18 = vmul.f32 0.03125, %v577_v17 }
 0x1a7   : > { %v579_v19 = vadd.f32 1e-12, %v578_v18 }
 0x1a9   : > { %869 = vrsqrt.f32 %v579_v19 }
 0x1b3   : > { %v870_v20 = vpop.eup %869 }
 0x1b4   : > { %v581_v22 = vmul.f32 %v870_v20, %v573_v14 }
 0x1b6   : > { %v589_v24 = vmul.f32 %v815_v21, %v581_v22 }
 0x1b8   : > { %v597_v25 = vadd.f32 %v816_v23, %v589_v24 }
 0x1ba   : > { %598 = vst.msk [vmem:[%s156_s16] sm:$0xff] %vm567_vm0, %v597_v25 }
 0x1bb   : > { %896 = shalt.err (!%p893_p7)
}
 0x1bc   : > { %s897_s9 = scalar_lea.hbm %s1106_s22, 128  ;;  %s901_s12 = scalar_lea.hbm %s1158_s5, 256 }
 0x1bd   : > { %p898_p8 = scmp.ne.s32.totalorder %s1106_s22, %s897_s9  ;;  %p902_p13 = scmp.lt.u32.totalorder %s1106_s22, %s1158_s5 }
 0x1be   : > { %p903_p0 = scmp.lt.u32.totalorder %s901_s12, %s897_s9  ;;  %p905_p2 = scmp.lt.u32.totalorder %s897_s9, %s1106_s22 }
 0x1bf   : > { %p899_p9 = pnand %p898_p8, %p1038_p10 }
 0x1c0   : > { %p904_p1 = por %p903_p0, %p902_p13 }
 0x1c1   : > { %p900_p12 = pneg %p899_p9 }
 0x1c2   : > { %p906_p3 = por %p905_p2, %p904_p1 }
 0x1c4   : > { %p907_p4 = pnand %p906_p3, %p900_p12 }
 0x1c6   : > { %910 = shalt.err (!%p907_p4)
}
 0x1c7   : > { %829 = dma.vmem_to_hbm [thread:$0]  (%p1038_p10), %s1108_s19, 128, %s1106_s22, %s600_s27  }
 0x1c8 PF: > { %p835_p5 = scmp.ge.s32.totalorder %s963_s25, 2  ;;  %s625_s15 = sand.u32 1, %s951_s23  }
 0x1c9   : > { %s626_s17 = scalar_lea.sflag [#allocation7], %s625_s15 }
 0x1ca   : > { %p832_p6 = pnand %p835_p5, %p1042_p11 }
 0x1cc   : > { %946 = dma.done.wait (!%p832_p6), %s626_s17, 128  }
 0x1cd   : > { %948 = vsyncadd (!%p832_p6), %s626_s17, 4294967168  ;;  %p21_p7 = scmp.ge.s32.totalorder %s1025_s28, 4   ;;  %s1161_s23 = smov %s955_s24 }
 0x1ce   : > { %s1162_s24 = smov %s959_s0  ;;  %s1163_s0 = smov %s1036_s6 }
 0x1cf   : > { %s1164_s25 = smov %s1025_s28  ;;  %23 = sbr.rel (!%p21_p7) target bundleno = 18 (0x12), region = 413 }
 0x1d6   :  { %631 = vsyncpa [#allocation7], 1 }
 0x1d7   :  { %633 = vsyncpa [#allocation7 + $0x1], 1 }
 0x1d8   :  { %634 = vsyncmov [#allocation3] }
 0x1db   :  { %s635_s25 = vpop.sfrf %634 }
 0x1dc   :  { %p821_p10 = scmp.ne.s32.totalorder %s635_s25, 0 }
 0x1de   :  { %639 = shalt.err (%p821_p10)  }
 0x1df   :  { %641 = vsyncmov [#allocation3 + $0x1] }
 0x1e2   :  { %s642_s7 = vpop.sfrf %641 }
 0x1e3   :  { %p822_p11 = scmp.ne.s32.totalorder %s642_s7, 0 }
 0x1e5   :  { %646 = shalt.err (%p822_p11)  }
 0x1e6   :  { %648 = vsyncmov [#allocation3 + $0x2] }
 0x1e9   :  { %s649_s8 = vpop.sfrf %648 }
 0x1ea   :  { %p823_p8 = scmp.ne.s32.totalorder %s649_s8, 0 }
 0x1ec   :  { %653 = shalt.err (%p823_p8)  }
 0x1ed   :  { %655 = vsyncmov [#allocation3 + $0x3] }
 0x1f0   :  { %s656_s18 = vpop.sfrf %655 }
 0x1f1   :  { %p824_p9 = scmp.ne.s32.totalorder %s656_s18, 0 }
 0x1f3   :  { %660 = shalt.err (%p824_p9)  }
 0x1f4   :  { %662 = vsyncmov [#allocation3 + $0x4] }
 0x1f7   :  { %s663_s28 = vpop.sfrf %662 }
 0x1f8   :  { %p825_p12 = scmp.ne.s32.totalorder %s663_s28, 0 }
 0x1fa   :  { %667 = shalt.err (%p825_p12)  }
 0x1fb   :  { %669 = vsyncmov [#allocation3 + $0x5] }
 0x1fe   :  { %s670_s1 = vpop.sfrf %669 }
 0x1ff   :  { %p826_p13 = scmp.ne.s32.totalorder %s670_s1, 0 }
 0x201   :  { %674 = shalt.err (%p826_p13)  }
 0x202   :  { %676 = vsyncmov [#allocation3 + $0x6] }
 0x205   :  { %s677_s2 = vpop.sfrf %676 }
 0x206   :  { %p827_p0 = scmp.ne.s32.totalorder %s677_s2, 0 }
 0x208   :  { %681 = shalt.err (%p827_p0)  }
 0x209   :  { %683 = vsyncmov [#allocation3 + $0x7] }
 0x20c   :  { %s684_s3 = vpop.sfrf %683 }
 0x20d   :  { %p828_p1 = scmp.ne.s32.totalorder %s684_s3, 0 }
 0x20f   :  { %688 = shalt.err (%p828_p1)  }

</bundles_post_ra>
